<compile_context>
chip_gen: v7x
topology: tpu7x:2x2x1
jax: 0.10.0
libtpu: 0.0.40
codegen_flags: <defaults>
</compile_context>

<pallas_src>
import jax
import jax.numpy as jnp
import numpy as np
from jax.experimental import pallas as pl
from jax.experimental.pallas import tpu as pltpu

EMB_DIM = 32
IN_CH = 2
OUT_CH = 10
K = 3
PAD = K // 2          # required so 10 * emb_dim matches fc.in_features
LANE = 128
SUBLANE = 8


def convtranse_kernel(x_ref, etgt_ref, m_ref, b_ref, out_ref):
    # x_ref    : [Bs, 2*Dp]  concat of (padded) head / relation embeddings
    # etgt_ref : [Bp, Dp]    padded score targets (gathered head embeddings)
    # m_ref    : [2*Dp, Dp]  folded conv+fc weight
    # b_ref    : [1, Dp]     folded bias
    # out_ref  : [Bs, Bp]    scores (lane-dense; wrapper slices [:B, :B])
    h = jnp.dot(x_ref[...], m_ref[...],
                preferred_element_type=jnp.float32) + b_ref[...]
    out_ref[...] = jax.lax.dot_general(
        h, etgt_ref[...], dimension_numbers=(((1,), (1,)), ((), ())),
        preferred_element_type=jnp.float32)


def _fold_params(conv_w, conv_b, fc_w, fc_b):
    """Fold Conv1d(pad=1) + Linear into (Me, Mr, b_eff). Exact (all linear)."""
    D = fc_b.shape[0]
    # fcw_split[c, l, d] = fc_w[d, c*D + l]  (channel-major flatten of x.view(B,-1))
    fcw_split = fc_w.T.reshape(OUT_CH, D, D).astype(jnp.float32)

    def row_shift(m, j):
        # out[row] = m[row - j], zero rows where out of range (conv zero pad).
        if j == 0:
            return m
        if j > 0:
            return jnp.concatenate([jnp.zeros((j, D), m.dtype), m[:-j]], axis=0)
        return jnp.concatenate([m[-j:], jnp.zeros((-j, D), m.dtype)], axis=0)

    Me = jnp.zeros((D, D), jnp.float32)
    Mr = jnp.zeros((D, D), jnp.float32)
    for c in range(OUT_CH):
        for k in range(K):
            shifted = row_shift(fcw_split[c], k - PAD)
            Me = Me + conv_w[c, 0, k].astype(jnp.float32) * shifted
            Mr = Mr + conv_w[c, 1, k].astype(jnp.float32) * shifted
    b_eff = fc_b.astype(jnp.float32) + jnp.einsum(
        "c,cld->d", conv_b.astype(jnp.float32), fcw_split)
    return Me, Mr, b_eff


def convtranse_forward(ent_emb, rel_emb, triples, conv_w, conv_b, fc_w, fc_b):
    B = triples.shape[0]
    D = ent_emb.shape[1]
    Dp = ((D + LANE - 1) // LANE) * LANE            # lane-dense emb dim
    Bs = ((B + SUBLANE - 1) // SUBLANE) * SUBLANE   # sublane-dense batch rows
    Bp = ((B + LANE - 1) // LANE) * LANE            # lane-dense score columns

    # Gather of triple embeddings is glue (data-dependent indexing stays in JAX).
    e = ent_emb[triples[:, 0]].astype(jnp.float32)  # [B, D]
    r = rel_emb[triples[:, 1]].astype(jnp.float32)  # [B, D]

    Me, Mr, b_eff = _fold_params(conv_w, conv_b, fc_w, fc_b)

    # Zero-pad everything to lane/sublane-dense shapes (exact).
    x_cat = jnp.zeros((Bs, 2 * Dp), jnp.float32)
    x_cat = x_cat.at[:B, :D].set(e).at[:B, Dp:Dp + D].set(r)
    e_tgt = jnp.zeros((Bp, Dp), jnp.float32).at[:B, :D].set(e)
    m_big = jnp.zeros((2 * Dp, Dp), jnp.float32)
    m_big = m_big.at[:D, :D].set(Me).at[Dp:Dp + D, :D].set(Mr)
    b_pad = jnp.zeros((1, Dp), jnp.float32).at[0, :D].set(b_eff)

    out = pl.pallas_call(
        convtranse_kernel,
        out_shape=jax.ShapeDtypeStruct((Bs, Bp), jnp.float32),
        in_specs=[
            pl.BlockSpec(memory_space=pltpu.MemorySpace.VMEM),  # x_cat
            pl.BlockSpec(memory_space=pltpu.MemorySpace.VMEM),  # e_tgt
            pl.BlockSpec(memory_space=pltpu.MemorySpace.VMEM),  # folded weight
            pl.BlockSpec(memory_space=pltpu.MemorySpace.VMEM),  # folded bias
        ],
        out_specs=pl.BlockSpec(memory_space=pltpu.MemorySpace.VMEM),
    )(x_cat, e_tgt, m_big, b_pad)
    return out[:B, :B]


def reference(ent_emb, rel_emb, triples, conv_w, conv_b, fc_w, fc_b):
    # Pure-JAX reference of the (repaired) PyTorch forward.
    e = ent_emb[triples[:, 0]]
    r = rel_emb[triples[:, 1]]
    stack = jnp.stack([e, r], axis=1)                        # [B, 2, D]  (NCH)
    x = jax.lax.conv_general_dilated(
        stack, conv_w, window_strides=(1,), padding=((PAD, PAD),),
        dimension_numbers=("NCH", "OIH", "NCH"))
    x = x + conv_b[None, :, None]
    x = x.reshape(triples.shape[0], -1)
    x = x @ fc_w.T + fc_b
    return x @ e.T


if __name__ == "__main__":
    key = jax.random.PRNGKey(0)
    k1, k2, k3, k4, k5, k6, k7 = jax.random.split(key, 7)

    num_ent, num_rel, batch = 20, 7, 8
    ent_emb = jax.random.normal(k1, (num_ent, EMB_DIM), jnp.float32)
    rel_emb = jax.random.normal(k2, (num_rel, EMB_DIM), jnp.float32)
    heads = jax.random.randint(k3, (batch,), 0, num_ent)
    rels = jax.random.randint(k4, (batch,), 0, num_rel)
    tails = jax.random.randint(k5, (batch,), 0, num_ent)
    triples = jnp.stack([heads, rels, tails], axis=1)        # [B, 3]

    # Deterministic synthetic parameters (shapes from ConvTransE.__init__).
    conv_w = 0.1 * jax.random.normal(k6, (OUT_CH, IN_CH, K), jnp.float32)
    conv_b = 0.01 * jnp.arange(OUT_CH, dtype=jnp.float32)
    fc_w = 0.05 * jax.random.normal(k7, (EMB_DIM, OUT_CH * EMB_DIM), jnp.float32)
    fc_b = 0.01 * jnp.arange(EMB_DIM, dtype=jnp.float32)

    out = convtranse_forward(ent_emb, rel_emb, triples, conv_w, conv_b, fc_w, fc_b)
    out = jax.block_until_ready(out)

    ref = reference(ent_emb, rel_emb, triples, conv_w, conv_b, fc_w, fc_b)
    np.testing.assert_allclose(np.asarray(out), np.asarray(ref), rtol=1e-4, atol=1e-4)
    print("KERNEL_OK")
</pallas_src>

<mosaic_0001>
module attributes {stable_mosaic.version = 11 : i64} {
  func.func @convtranse_kernel(%arg0: memref<8x256xf32, #tpu.memory_space<vmem>>, %arg1: memref<128x128xf32, #tpu.memory_space<vmem>>, %arg2: memref<256x128xf32, #tpu.memory_space<vmem>>, %arg3: memref<1x128xf32, #tpu.memory_space<vmem>>, %arg4: memref<8x128xf32, #tpu.memory_space<vmem>>) attributes {dimension_semantics = [], scalar_prefetch = 0 : i64, scratch_operands = 0 : i64, tpu.core_type = #tpu.core_type<tc>} {
    %c0 = arith.constant 0 : index
    %c0_0 = arith.constant 0 : index
    %0 = vector.load %arg0[%c0, %c0_0] : memref<8x256xf32, #tpu.memory_space<vmem>>, vector<8x256xf32>
    %c0_1 = arith.constant 0 : index
    %c0_2 = arith.constant 0 : index
    %1 = vector.load %arg2[%c0_1, %c0_2] : memref<256x128xf32, #tpu.memory_space<vmem>>, vector<256x128xf32>
    %cst = arith.constant dense<0.000000e+00> : vector<8x128xf32>
    %2 = tpu.matmul %0, %1, %cst {dimension_numbers = #tpu.dot_dimension_numbers<[1], [0], [0], [1], [0, 0, 1, 1], [], []>} : vector<8x256xf32>, vector<256x128xf32>, vector<8x128xf32> -> vector<8x128xf32>
    %c0_3 = arith.constant 0 : index
    %c0_4 = arith.constant 0 : index
    %3 = vector.load %arg3[%c0_3, %c0_4] : memref<1x128xf32, #tpu.memory_space<vmem>>, vector<1x128xf32>
    %4 = vector.broadcast %3 : vector<1x128xf32> to vector<8x128xf32>
    %5 = arith.addf %2, %4 : vector<8x128xf32>
    %c0_5 = arith.constant 0 : index
    %c0_6 = arith.constant 0 : index
    %6 = vector.load %arg1[%c0_5, %c0_6] : memref<128x128xf32, #tpu.memory_space<vmem>>, vector<128x128xf32>
    %cst_7 = arith.constant dense<0.000000e+00> : vector<8x128xf32>
    %7 = tpu.matmul %5, %6, %cst_7 {dimension_numbers = #tpu.dot_dimension_numbers<[1], [1], [0], [0], [0, 0, 1, 0], [], []>} : vector<8x128xf32>, vector<128x128xf32>, vector<8x128xf32> -> vector<8x128xf32>
    %c0_8 = arith.constant 0 : index
    %c0_9 = arith.constant 0 : index
    %8 = vector.load %arg4[%c0_8, %c0_9] : memref<8x128xf32, #tpu.memory_space<vmem>>, vector<8x128xf32>
    tpu.vector_store %arg4[%c0_8, %c0_9], %7 {strides = array<i32>} : memref<8x128xf32, #tpu.memory_space<vmem>>, vector<8x128xf32>,
    return
  }
}

</mosaic_0001>

<bundles_post_ra>
// kernel: tpu_custom_call.1
= control target key start
LH: loop header
LB: loop body
LE: loop exit
PB: predicated region body
PF: predicated region fallthrough
CT: control target
= control target key end

     0   :  { %9 = vsyncpa [#allocation3], 0  ;;  %s617_s0 = inlined_call_operand.hbm [shape: f32[8,256], index: 0, kind: input, shape index: {}]   ;;  %s618_s1 = inlined_call_operand.hbm [shape: f32[128,128], index: 1, kind: input, shape index: {}]   ;;  %s619_s2 = inlined_call_operand.hbm [shape: f32[256,128], index: 2, kind: input, shape index: {}]   ;;  %s620_s3 = inlined_call_operand.vmem [shape: f32[1,128], index: 3, kind: input, shape index: {}]   ;;  %s621_s4 = inlined_call_operand.hbm [shape: f32[8,128], index: 4, kind: output, shape index: {}]  }
   0x1   :  { %10 = vsyncpa [#allocation6], 0 }
   0x2   :  { %11 = vsyncpa [#allocation4], 0  ;;  %s518_s15 = smov [#allocation5]   ;;  %s424_s19 = scalar_lea.hbm %s618_s1, 2048 }
   0x3   :  { %s27_s16 = sshll.u32 %s518_s15, 4  ;;  %p425_p0 = scmp.ne.s32.totalorder %s618_s1, %s424_s19  ;;  %s28_s16 = int_to_ptr.vmem [resolvable:$true] %s27_s16 }
   0x4   :  { %p428_p1 = scmp.lt.u32.totalorder %s424_s19, %s618_s1 }
   0x6   :  { %p430_p2 = pnand %p428_p1, %p425_p0 }
   0x8   :  { %433 = shalt.err (!%p430_p2)
}
   0x9   :  { %s434_s24 = scalar_lea.vmem %s28_s16, 2048  ;;  %p439_p4 = scmp.lt.s32.totalorder %s28_s16, %s28_s16 }
   0xa   :  { %p435_p3 = scmp.ne.s32.totalorder %s28_s16, %s434_s24  ;;  %p440_p5 = scmp.lt.s32.totalorder %s434_s24, %s434_s24 }
   0xc   :  { %p441_p6 = por %p440_p5, %p439_p4 }
   0xe   :  { %p442_p7 = pnand %p441_p6, %p435_p3 }
  0x10   :  { %445 = shalt.err (!%p442_p7)
}
  0x11   :  { %s519_s25 = smov 128   ;;  %s520_s26 = smov 8  }
  0x12   :  { %33 = dma.hbm_to_vmem [thread:$0]  %s618_s1, 2048, %s28_s16, [#allocation6], %s519_s25, %s519_s25, %s520_s26  }
  0x13   :  { %s521_s29 = smov [#allocation2]   ;;  %s522_s5 = smov [#allocation7]  }
  0x14   :  { %s18_s30 = sshll.u32 %s521_s29, 4  ;;  %s39_s6 = sshll.u32 %s522_s5, 4  ;;  %s19_s30 = int_to_ptr.vmem [resolvable:$true] %s18_s30  ;;  %s40_s6 = int_to_ptr.vmem [resolvable:$true] %s39_s6 }
  0x15   :  { %s446_s9 = scalar_lea.hbm %s617_s0, 256 }
  0x16   :  { %p447_p8 = scmp.ne.s32.totalorder %s617_s0, %s446_s9  ;;  %p450_p9 = scmp.lt.u32.totalorder %s446_s9, %s617_s0 }
  0x18   :  { %p452_p10 = pnand %p450_p9, %p447_p8 }
  0x1a   :  { %455 = shalt.err (!%p452_p10)
}
  0x1b   :  { %s456_s1 = scalar_lea.vmem %s19_s30, 256  ;;  %p461_p12 = scmp.lt.s32.totalorder %s19_s30, %s19_s30 }
  0x1c   :  { %p457_p11 = scmp.ne.s32.totalorder %s19_s30, %s456_s1  ;;  %p462_p13 = scmp.lt.s32.totalorder %s456_s1, %s456_s1 }
  0x1e   :  { %p463_p0 = por %p462_p13, %p461_p12 }
  0x20   :  { %p464_p1 = pnand %p463_p0, %p457_p11 }
  0x22   :  { %467 = shalt.err (!%p464_p1)
}
  0x23   :  { %21 = dma.hbm_to_vmem [thread:$0]  %s617_s0, 256, %s19_s30, [#allocation3]  }
  0x24   :  { %s468_s18 = scalar_lea.hbm %s619_s2, 4096 }
  0x25   :  { %p469_p2 = scmp.ne.s32.totalorder %s619_s2, %s468_s18  ;;  %p472_p3 = scmp.lt.u32.totalorder %s468_s18, %s619_s2 }
  0x27   :  { %p474_p4 = pnand %p472_p3, %p469_p2 }
  0x29   :  { %477 = shalt.err (!%p474_p4)
}
  0x2a   :  { %s478_s23 = scalar_lea.vmem %s40_s6, 4096  ;;  %p483_p6 = scmp.lt.s32.totalorder %s40_s6, %s40_s6 }
  0x2b   :  { %p479_p5 = scmp.ne.s32.totalorder %s40_s6, %s478_s23  ;;  %p484_p7 = scmp.lt.s32.totalorder %s478_s23, %s478_s23 }
  0x2d   :  { %p485_p8 = por %p484_p7, %p483_p6 }
  0x2f   :  { %p486_p9 = pnand %p485_p8, %p479_p5 }
  0x31   :  { %489 = shalt.err (!%p486_p9)
}
  0x32   :  { %45 = dma.hbm_to_vmem [thread:$0]  %s619_s2, 4096, %s40_s6, [#allocation6], %s519_s25, %s519_s25, %s520_s26  }
  0x33   :  { %512 = dma.done.wait [#allocation3], 256  }
  0x34   :  { %513 = vsyncadd [#allocation3], 4294967040 }
  0x35   :  { %514 = dma.done.wait [#allocation6], 6144  }
  0x36   :  { %515 = vsyncadd [#allocation6], 4294961152  ;;  %v523_v0 = vmov 0.0|0.0   ;;  %v75_v1 = vld [vmem:[#allocation7 + $0x80] sm:$0xff]  ;;  %v76_v2 = vld [vmem:[#allocation7 + $0x88] sm:$0xff]  ;;  %vm524_vm0 = vmmov 0  }
  0x37   :  { %391 = vmatprep.subr.bf16.mxu1 %v523_v0  ;;  %v59_v3 = vld [vmem:[#allocation7] sm:$0xff]  ;;  %v359_v4 = vpack.c.bf16 %v76_v2, %v75_v1  ;;  %v60_v5 = vld [vmem:[#allocation7 + $0x8] sm:$0xff]  ;;  %v77_v6 = vld [vmem:[#allocation7 + $0x90] sm:$0xff]  ;;  %s526_s26 = smov [#allocation8]  }
  0x38   :  { %v78_v7 = vld [vmem:[#allocation7 + $0x98] sm:$0xff]  ;;  %v361_v8 = vpack.c.bf16 %v60_v5, %v59_v3  ;;  %v61_v10 = vld [vmem:[#allocation7 + $0x10] sm:$0xff]  ;;  %v79_v12 = vld [vmem:[#allocation7 + $0xa0] sm:$0xff]  ;;  %s261_s27 = sshll.u32 %s526_s26, 4  ;;  %s262_s27 = int_to_ptr.vmem [resolvable:$true] %s261_s27 }
  0x39   :  { %v363_v9 = vpack.c.bf16 %v78_v7, %v77_v6  ;;  %v62_v11 = vld [vmem:[#allocation7 + $0x18] sm:$0xff]  ;;  %360 = vmatprep.subr.bf16.mxu0 %v359_v4  ;;  %v80_v13 = vld [vmem:[#allocation7 + $0xa8] sm:$0xff]  ;;  %v63_v16 = vld [vmem:[#allocation7 + $0x20] sm:$0xff]  ;;  %s490_s28 = scalar_lea.vmem %s262_s27, 128  ;;  %p495_p11 = scmp.lt.s32.totalorder %s262_s27, %s262_s27 }
  0x3a   :  { %362 = vmatpush3.bf16.msra.mxu0 %v361_v8  ;;  %v365_v14 = vpack.c.bf16 %v62_v11, %v61_v10  ;;  %v367_v15 = vpack.c.bf16 %v80_v13, %v79_v12  ;;  %v64_v17 = vld [vmem:[#allocation7 + $0x28] sm:$0xff]  ;;  %v81_v18 = vld [vmem:[#allocation7 + $0xb0] sm:$0xff]  ;;  %v82_v19 = vld [vmem:[#allocation7 + $0xb8] sm:$0xff]  ;;  %v525_v12 = vmov 0.0   ;;  %p491_p10 = scmp.ne.s32.totalorder %s262_s27, %s490_s28  ;;  %p496_p12 = scmp.lt.s32.totalorder %s490_s28, %s490_s28 }
  0x3b   :  { %364 = vmatprep.subr.bf16.mxu0 %v363_v9  ;;  %v369_v20 = vpack.c.bf16 %v64_v17, %v63_v16  ;;  %v371_v21 = vpack.c.bf16 %v82_v19, %v81_v18  ;;  %v65_v22 = vld [vmem:[#allocation7 + $0x30] sm:$0xff]  ;;  %v66_v23 = vld [vmem:[#allocation7 + $0x38] sm:$0xff]  ;;  %v83_v24 = vld [vmem:[#allocation7 + $0xc0] sm:$0xff]  ;;  %356 = vmatprep.mubr.msk.f32.mxu1 %vm524_vm0, %v525_v12 }
  0x3c   :  { %v84_v25 = vld [vmem:[#allocation7 + $0xc8] sm:$0xff]  ;;  %v58_v26 = vld [vmem:[#allocation2 + $0x8] sm:$0xff]  ;;  %v168_v27 = vld [vmem:[#allocation5] sm:$0xff]  ;;  %v373_v29 = vpack.c.bf16 %v66_v23, %v65_v22  ;;  %p497_p13 = por %p496_p12, %p495_p11 }
  0x3d   :  { %162 = vmatprep.mubr.f32.mxu0 %v58_v26  ;;  %v169_v28 = vld [vmem:[#allocation5 + $0x8] sm:$0xff]  ;;  %v375_v31 = vpack.c.bf16 %v84_v25, %v83_v24  ;;  %v67_v32 = vld [vmem:[#allocation7 + $0x40] sm:$0xff]  ;;  %v85_v34 = vld [vmem:[#allocation7 + $0xd0] sm:$0xff] }
  0x3e   :  { %366 = vmatpush3.bf16.msra.mxu0 %v365_v14  ;;  %v392_v30 = vpack.c.bf16 %v169_v28, %v168_v27  ;;  %v68_v33 = vld [vmem:[#allocation7 + $0x48] sm:$0xff]  ;;  %v86_v35 = vld [vmem:[#allocation7 + $0xd8] sm:$0xff]  ;;  %v170_v36 = vld [vmem:[#allocation5 + $0x10] sm:$0xff]  ;;  %p498_p0 = pnand %p497_p13, %p491_p10 }
  0x3f   :  { %368 = vmatprep.subr.bf16.mxu0 %v367_v15  ;;  %v171_v37 = vld [vmem:[#allocation5 + $0x18] sm:$0xff]  ;;  %v377_v38 = vpack.c.bf16 %v68_v33, %v67_v32  ;;  %v379_v39 = vpack.c.bf16 %v86_v35, %v85_v34  ;;  %v69_v40 = vld [vmem:[#allocation7 + $0x50] sm:$0xff]  ;;  %v87_v42 = vld [vmem:[#allocation7 + $0xe0] sm:$0xff] }
  0x40   :  { %393 = vmatpush3.bf16.xpose.msra.mxu1 %v392_v30  ;;  %v70_v41 = vld [vmem:[#allocation7 + $0x58] sm:$0xff]  ;;  %v88_v43 = vld [vmem:[#allocation7 + $0xe8] sm:$0xff]  ;;  %v395_v44 = vpack.c.bf16 %v171_v37, %v170_v36  ;;  %v71_v47 = vld [vmem:[#allocation7 + $0x60] sm:$0xff] }
  0x41   :  { %394 = vmatprep.subr.bf16.mxu1 %v523_v0  ;;  %v381_v45 = vpack.c.bf16 %v70_v41, %v69_v40  ;;  %v383_v46 = vpack.c.bf16 %v88_v43, %v87_v42  ;;  %v72_v48 = vld [vmem:[#allocation7 + $0x68] sm:$0xff]  ;;  %v89_v49 = vld [vmem:[#allocation7 + $0xf0] sm:$0xff]  ;;  %v90_v50 = vld [vmem:[#allocation7 + $0xf8] sm:$0xff] }
  0x42   :  { %370 = vmatpush3.bf16.msra.mxu0 %v369_v20  ;;  %v172_v51 = vld [vmem:[#allocation5 + $0x20] sm:$0xff]  ;;  %v173_v52 = vld [vmem:[#allocation5 + $0x28] sm:$0xff]  ;;  %v385_v53 = vpack.c.bf16 %v72_v48, %v71_v47  ;;  %v387_v54 = vpack.c.bf16 %v90_v50, %v89_v49  ;;  %v73_v55 = vld [vmem:[#allocation7 + $0x70] sm:$0xff] }
  0x43   :  { %372 = vmatprep.subr.bf16.mxu0 %v371_v21  ;;  %v74_v56 = vld [vmem:[#allocation7 + $0x78] sm:$0xff]  ;;  %v398_v57 = vpack.c.bf16 %v173_v52, %v172_v51  ;;  %v174_v59 = vld [vmem:[#allocation5 + $0x30] sm:$0xff]  ;;  %v176_v63 = vld [vmem:[#allocation5 + $0x40] sm:$0xff] }
  0x44   :  { %v389_v58 = vpack.c.bf16 %v74_v56, %v73_v55  ;;  %v175_v60 = vld [vmem:[#allocation5 + $0x38] sm:$0xff]  ;;  %v57_v61 = vld [vmem:[#allocation2] sm:$0xff]  ;;  %v177_v1 = vld [vmem:[#allocation5 + $0x48] sm:$0xff] }
  0x45   :  { %v401_v62 = vpack.c.bf16 %v175_v60, %v174_v59  ;;  %v404_v2 = vpack.c.bf16 %v177_v1, %v176_v63  ;;  %v178_v3 = vld [vmem:[#allocation5 + $0x50] sm:$0xff]  ;;  %v179_v4 = vld [vmem:[#allocation5 + $0x58] sm:$0xff]  ;;  %v180_v6 = vld [vmem:[#allocation5 + $0x60] sm:$0xff] }
  0x46   :  { %374 = vmatpush3.bf16.msra.mxu0 %v373_v29  ;;  %v407_v5 = vpack.c.bf16 %v179_v4, %v178_v3  ;;  %v181_v7 = vld [vmem:[#allocation5 + $0x68] sm:$0xff]  ;;  %v182_v9 = vld [vmem:[#allocation5 + $0x70] sm:$0xff]  ;;  %v183_v10 = vld [vmem:[#allocation5 + $0x78] sm:$0xff] }
  0x47   :  { %376 = vmatprep.subr.bf16.mxu0 %v375_v31  ;;  %v410_v8 = vpack.c.bf16 %v181_v7, %v180_v6  ;;  %v413_v11 = vpack.c.bf16 %v183_v10, %v182_v9  ;;  %v271_v14 = vld [vmem:[%s620_s3] ss:$0 sm:$0xff] }
  0x48   :  { %396 = vmatpush3.bf16.xpose.msra.mxu1 %v395_v44 }
  0x49   :  { %397 = vmatprep.subr.bf16.mxu1 %v523_v0 }
  0x4a   :  { %378 = vmatpush3.bf16.msra.mxu0 %v377_v38 }
  0x4b   :  { %380 = vmatprep.subr.bf16.mxu0 %v379_v39 }
  0x4e   :  { %382 = vmatpush3.bf16.msra.mxu0 %v381_v45 }
  0x4f   :  { %384 = vmatprep.subr.bf16.mxu0 %v383_v46 }
  0x50   :  { %399 = vmatpush3.bf16.xpose.msra.mxu1 %v398_v57 }
  0x51   :  { %400 = vmatprep.subr.bf16.mxu1 %v523_v0 }
  0x52   :  { %386 = vmatpush3.bf16.msra.mxu0 %v385_v53 }
  0x53   :  { %388 = vmatprep.subr.bf16.mxu0 %v387_v54 }
  0x56   :  { %390 = vmatpush3.bf16.msra.mxu0 %v389_v58 }
  0x58   :  { %402 = vmatpush3.bf16.xpose.msra.mxu1 %v401_v62 }
  0x59   :  { %163 = vmatmul.mubr.f32.vlgmr.msra.gmra.mrb[0].mxu0 %v57_v61  ;;  %403 = vmatprep.subr.bf16.mxu1 %v523_v0 }
  0x60   :  { %405 = vmatpush3.bf16.xpose.msra.mxu1 %v404_v2 }
  0x61   :  { %406 = vmatprep.subr.bf16.mxu1 %v523_v0 }
  0x68   :  { %408 = vmatpush3.bf16.xpose.msra.mxu1 %v407_v5 }
  0x69   :  { %409 = vmatprep.subr.bf16.mxu1 %v523_v0 }
  0x70   :  { %411 = vmatpush3.bf16.xpose.msra.mxu1 %v410_v8 }
  0x71   :  { %412 = vmatprep.subr.bf16.mxu1 %v523_v0 }
  0x78   :  { %414 = vmatpush3.bf16.xpose.msra.mxu1 %v413_v11 }
 0x12c   :  { %v304_v13 = vpop.f32.mrb[0].mxu0 }
 0x12d   :  { %v305_v15 = vpop.f32.mrb[1].mxu0 }
 0x12e   :  { %v306_v16 = vadd.f32 %v305_v15, %v304_v13 }
 0x130   :  { %v165_v17 = vadd.f32 %v306_v16, %v271_v14 }
 0x132   :  { %357 = vmatmul.mubr.f32.vlgmr.msra.gmra.mrb[0].mxu1 %v165_v17 }
 0x205   :  { %v250_v0 = vpop.f32.mrb[0].mxu1 }
 0x206   :  { %254 = vst [vmem:[#allocation8] sm:$0xff] %v250_v0  ;;  %v358_v18 = vpop.f32.mrb[1].mxu1 }
 0x207   :  { %501 = shalt.err (!%p498_p0)
}
 0x208   :  { %s502_s3 = scalar_lea.hbm %s621_s4, 128 }
 0x209   :  { %p503_p1 = scmp.ne.s32.totalorder %s621_s4, %s502_s3  ;;  %p506_p2 = scmp.lt.u32.totalorder %s502_s3, %s621_s4 }
 0x20b   :  { %p508_p3 = pnand %p506_p2, %p503_p1 }
 0x20d   :  { %511 = shalt.err (!%p508_p3)
}
 0x20e   :  { %264 = dma.vmem_to_hbm [thread:$0]  %s262_s27, 128, %s621_s4, [#allocation4]  }
 0x20f   :  { %516 = dma.done.wait [#allocation4], 128  }
 0x210   :  { %517 = vsyncadd [#allocation4], 4294967168 }
 0x211   :  { %268 = vsyncpa [#allocation3], 1 }
 0x212   :  { %269 = vsyncpa [#allocation6], 1 }
 0x213   :  { %270 = vsyncpa [#allocation4], 1 }

</bundles_post_ra>
